<compile_context>
chip_gen: v5e
topology: v5e:2x2
jax: 0.10.0
libtpu: 0.0.40
codegen_flags: <defaults>
</compile_context>

<pallas_src>
import jax
import jax.numpy as jnp
from jax.experimental import pallas as pl
from jax.experimental.pallas import tpu as pltpu


# ---------------------------------------------------------------------------
# Pallas kernel: fused two-backbone stem + global pool (row-sum accumulator).
# grid = (NUM_CORES, n_blocks_per_core); axis 0 "parallel", axis 1 "arbitrary".
# ---------------------------------------------------------------------------
def _stem_pool_kernel(x_ref, w1_ref, b1_ref, out_ref, acc_ref):
    i = pl.program_id(1)

    @pl.when(i == 0)
    def _():
        acc_ref[...] = jnp.zeros_like(acc_ref)

    # (R, K)bf16 @ (K, 2H)bf16 -> f32, + bias, ReLU, row-sum into accumulator.
    # Padded rows are zeros -> contribute exactly ReLU(b1); corrected outside.
    h = jnp.dot(x_ref[...], w1_ref[...], preferred_element_type=jnp.float32)
    h = jnp.maximum(h + b1_ref[...], 0.0)
    acc_ref[...] += jnp.sum(h, axis=0, keepdims=True)

    @pl.when(i == pl.num_programs(1) - 1)
    def _():
        # Lane-dense (8, 2H) per-core partial-sum tile (row 0 is the payload).
        out_ref[...] = jnp.broadcast_to(acc_ref[...], out_ref.shape)


def _run_stem_pool(x_rows, w1, b1, *, rows_per_block, n_blocks_per_core, num_cores):
    total_rows, patch_dim = x_rows.shape
    two_hidden = w1.shape[1]
    assert total_rows == num_cores * n_blocks_per_core * rows_per_block

    # Explicit VMEM budget with headroom (double-buffered x, f32 intermediate,
    # double-buffered weights); stays well under v7x's 64 MiB physical VMEM.
    x_blk = rows_per_block * patch_dim * 2
    h_blk = rows_per_block * two_hidden * 4
    w_blk = patch_dim * two_hidden * 2
    vmem_est = 2 * x_blk + h_blk + 2 * w_blk + (1 << 20)
    vmem_limit = int(min(56 * 1024 * 1024, max(32 * 1024 * 1024, 2 * vmem_est)))

    return pl.pallas_call(
        _stem_pool_kernel,
        out_shape=jax.ShapeDtypeStruct((num_cores * 8, two_hidden), jnp.float32),
        grid_spec=pltpu.PrefetchScalarGridSpec(
            num_scalar_prefetch=0,
            grid=(num_cores, n_blocks_per_core),
            in_specs=[
                pl.BlockSpec((rows_per_block, patch_dim),
                             lambda c, i: (c * n_blocks_per_core + i, 0)),
                pl.BlockSpec((patch_dim, two_hidden), lambda c, i: (0, 0)),
                pl.BlockSpec((1, two_hidden), lambda c, i: (0, 0)),
            ],
            out_specs=pl.BlockSpec((8, two_hidden), lambda c, i: (c, 0)),
            scratch_shapes=[pltpu.VMEM((1, two_hidden), jnp.float32)],
        ),
        compiler_params=pltpu.CompilerParams(
            dimension_semantics=("parallel", "arbitrary"),
            vmem_limit_bytes=vmem_limit),
    )(x_rows, w1, b1)


# ---------------------------------------------------------------------------
# Host-side glue: patchify (layout plumbing) + deterministic parameters.
# ---------------------------------------------------------------------------
def _patchify_rows(frames, patch):
    # frames: (N, H, W, 3) -> (N * P, patch*patch*3), channel fastest in a patch.
    n, h, w, c = frames.shape
    hp, wp = h // patch, w // patch
    frames = frames[:, :hp * patch, :wp * patch, :]
    x = frames.reshape(n, hp, patch, wp, patch, c)
    x = x.transpose(0, 1, 3, 2, 4, 5)
    return x.reshape(n * hp * wp, patch * patch * c), hp * wp


def _make_params(key, patch_dim, hidden, feat_dim):
    k1, k2, k3, k4 = jax.random.split(key, 4)
    w1 = jax.random.normal(k1, (patch_dim, hidden), jnp.float32) * 0.05
    b1 = jax.random.normal(k2, (1, hidden), jnp.float32) * 0.01
    w2 = jax.random.normal(k3, (hidden, feat_dim), jnp.float32) * 0.05
    b2 = jax.random.normal(k4, (feat_dim,), jnp.float32) * 0.01
    return w1, b1, w2, b2


class VisualFeatureExtractorPallas:
    """Pallas port of VisualFeatureExtractor.forward semantics."""

    PATCH = 8                 # -> K = 8*8*3 = 192 contraction depth
    HIDDEN = 128              # per backbone
    FEAT_DIM = 2048           # per backbone (resnet50 / inception_v3 pooled dims)
    NUM_CORES = 2             # leading parallel grid axis (both TCs on v7x)
    MAX_ROWS_PER_BLOCK = 4096

    def __init__(self, param_key=jax.random.PRNGKey(42)):
        kr, ki = jax.random.split(param_key)
        patch_dim = self.PATCH * self.PATCH * 3
        w1_r, b1_r, w2_r, b2_r = _make_params(kr, patch_dim, self.HIDDEN, self.FEAT_DIM)
        w1_i, b1_i, w2_i, b2_i = _make_params(ki, patch_dim, self.HIDDEN, self.FEAT_DIM)

        mean = jnp.array([0.485, 0.456, 0.406], jnp.float32)
        std = jnp.array([0.229, 0.224, 0.225], jnp.float32)
        reps = self.PATCH * self.PATCH
        # resnet preprocess:    (x - mean) / std     == x * (1/std)       - mean/std
        # inception preprocess: (x/255 - mean) / std == x * (1/(255*std)) - mean/std
        resnet_scale = jnp.tile(1.0 / std, reps)               # (patch_dim,)
        inception_scale = jnp.tile(1.0 / (255.0 * std), reps)  # (patch_dim,)
        norm_offset = jnp.tile(mean / std, reps)[None, :]      # (1, patch_dim)

        # Fold normalization into stem weights:
        #   (x*scale - offset) @ w1 + b1 == x @ (diag(scale)@w1) + (b1 - offset@w1)
        w1_rf = resnet_scale[:, None] * w1_r
        b1_rf = b1_r - norm_offset @ w1_r
        w1_if = inception_scale[:, None] * w1_i
        b1_if = b1_i - norm_offset @ w1_i

        # Fuse the two backbone stems along the hidden axis; bf16 weights (MXU).
        self.w1 = jnp.concatenate([w1_rf, w1_if], axis=1).astype(jnp.bfloat16)
        self.b1 = jnp.concatenate([b1_rf, b1_if], axis=1)   # (1, 2H) f32 bias
        # Heads stay f32 and run once in XLA on the pooled vector.
        self.w2_r, self.b2_r = w2_r, b2_r
        self.w2_i, self.b2_i = w2_i, b2_i

    def __call__(self, frames):
        # frames: (N, H, W, 3) float32 pixel values (0..255)
        # TODO(synk): grayscale->BGR conversion and cv2 resize (224/299) are
        #             image-IO preprocessing with no Pallas equivalent; inputs
        #             are assumed already 3-channel at the working resolution.
        if frames.shape[0] == 0:
            return jnp.zeros((2 * self.FEAT_DIM,), jnp.float32)

        n_frames = int(frames.shape[0])
        x_rows, patches_per_frame = _patchify_rows(
            frames.astype(jnp.float32), self.PATCH)
        n_rows = x_rows.shape[0]

        # Row-block layout, bucketed to power-of-two block counts so distinct
        # clip lengths map to a small set of compiled kernel variants.
        rows_per_core = pl.cdiv(n_rows, self.NUM_CORES)
        rows_per_block = min(self.MAX_ROWS_PER_BLOCK,
                             max(8, pl.next_power_of_2(rows_per_core)))
        n_blocks_per_core = pl.next_power_of_2(pl.cdiv(rows_per_core, rows_per_block))
        padded_rows = self.NUM_CORES * n_blocks_per_core * rows_per_block

        pad = padded_rows - n_rows
        if pad:
            x_rows = jnp.pad(x_rows, ((0, pad), (0, 0)))
        x_rows = x_rows.astype(jnp.bfloat16)   # exact for 0..255 integer pixels

        partial = _run_stem_pool(
            x_rows, self.w1, self.b1,
            rows_per_block=rows_per_block,
            n_blocks_per_core=n_blocks_per_core,
            num_cores=self.NUM_CORES)

        # Finish in plain f32 XLA: combine per-core partial sums, remove the
        # padded rows' constant ReLU(b1) contribution, scale once by 1/(P*N),
        # then run the two linear heads (M=1 GEMVs; heads commute with the mean).
        per_core = partial.reshape(self.NUM_CORES, 8, -1)[:, 0, :]
        total = per_core.sum(axis=0)                                   # (2H,)
        total = total - float(pad) * jnp.maximum(self.b1[0], 0.0)
        pooled = total * (1.0 / (patches_per_frame * n_frames))
        feat_r = pooled[: self.HIDDEN] @ self.w2_r + self.b2_r         # (2048,)
        feat_i = pooled[self.HIDDEN:] @ self.w2_i + self.b2_i          # (2048,)

        # concat(mean-over-frames resnet feats, mean-over-frames inception feats)
        return jnp.concatenate([feat_r, feat_i])


if __name__ == "__main__":
    extractor = VisualFeatureExtractorPallas()

    key = jax.random.PRNGKey(0)
    # 6 small "frames", 16x16 RGB, pixel values in [0, 255]
    frames = jax.random.uniform(key, (6, 16, 16, 3), jnp.float32) * 255.0

    feats = extractor(frames)
    feats = jax.block_until_ready(feats)

    assert feats.shape == (4096,), feats.shape
    assert feats.dtype == jnp.float32
    assert bool(jnp.all(jnp.isfinite(feats)))
    print("KERNEL_OK")
</pallas_src>

<mosaic_0001>
module attributes {stable_mosaic.version = 11 : i64} {
  func.func @_stem_pool_kernel(%arg0: i32, %arg1: i32, %arg2: memref<16x192xbf16, #tpu.memory_space<vmem>>, %arg3: memref<192x256xbf16, #tpu.memory_space<vmem>>, %arg4: memref<1x256xf32, #tpu.memory_space<vmem>>, %arg5: memref<8x256xf32, #tpu.memory_space<vmem>>, %arg6: memref<1x256xf32, #tpu.memory_space<vmem>>) attributes {dimension_semantics = [#tpu.dimension_semantics<parallel>, #tpu.dimension_semantics<arbitrary>], iteration_bounds = array<i64: 2, 1>, scalar_prefetch = 0 : i64, scratch_operands = 1 : i64, tpu.core_type = #tpu.core_type<tc>, window_params = [{transform_indices = @transform_0, window_bounds = array<i64: 16, 192>}, {pipeline_mode = #tpu.pipeline_mode<synchronous>, transform_indices = @transform_1, window_bounds = array<i64: 192, 256>}, {pipeline_mode = #tpu.pipeline_mode<synchronous>, transform_indices = @transform_2, window_bounds = array<i64: 1, 256>}, {transform_indices = @transform_3, window_bounds = array<i64: 8, 256>}]} {
    %c0_i32 = arith.constant 0 : i32
    %0 = arith.cmpi eq, %arg1, %c0_i32 : i32
    %1 = arith.extui %0 : i1 to i32
    %c0_i32_0 = arith.constant 0 : i32
    %2 = arith.cmpi ne, %1, %c0_i32_0 : i32
    scf.if %2 {
      %cst_14 = arith.constant 0.000000e+00 : f32
      %19 = vector.broadcast %cst_14 : f32 to vector<1x256xf32>
      %c0_15 = arith.constant 0 : index
      %c0_16 = arith.constant 0 : index
      %20 = vector.load %arg6[%c0_15, %c0_16] : memref<1x256xf32, #tpu.memory_space<vmem>>, vector<1x256xf32>
      tpu.vector_store %arg6[%c0_15, %c0_16], %19 {strides = array<i32>} : memref<1x256xf32, #tpu.memory_space<vmem>>, vector<1x256xf32>,
    } else {
    }
    %c0 = arith.constant 0 : index
    %c0_1 = arith.constant 0 : index
    %3 = vector.load %arg2[%c0, %c0_1] : memref<16x192xbf16, #tpu.memory_space<vmem>>, vector<16x192xbf16>
    %c0_2 = arith.constant 0 : index
    %c0_3 = arith.constant 0 : index
    %4 = vector.load %arg3[%c0_2, %c0_3] : memref<192x256xbf16, #tpu.memory_space<vmem>>, vector<192x256xbf16>
    %cst = arith.constant dense<0.000000e+00> : vector<16x256xf32>
    %5 = tpu.matmul %3, %4, %cst {dimension_numbers = #tpu.dot_dimension_numbers<[1], [0], [0], [1], [0, 0, 1, 1], [], []>} : vector<16x192xbf16>, vector<192x256xbf16>, vector<16x256xf32> -> vector<16x256xf32>
    %c0_4 = arith.constant 0 : index
    %c0_5 = arith.constant 0 : index
    %6 = vector.load %arg4[%c0_4, %c0_5] : memref<1x256xf32, #tpu.memory_space<vmem>>, vector<1x256xf32>
    %7 = vector.broadcast %6 : vector<1x256xf32> to vector<16x256xf32>
    %8 = arith.addf %5, %7 : vector<16x256xf32>
    %cst_6 = arith.constant 0.000000e+00 : f32
    %9 = vector.broadcast %cst_6 : f32 to vector<16x256xf32>
    %10 = arith.maximumf %8, %9 : vector<16x256xf32>
    %c0_7 = arith.constant 0 : index
    %c0_8 = arith.constant 0 : index
    %11 = vector.load %arg6[%c0_7, %c0_8] : memref<1x256xf32, #tpu.memory_space<vmem>>, vector<1x256xf32>
    %cst_9 = arith.constant dense<0.000000e+00> : vector<256xf32>
    %12 = vector.multi_reduction <add>, %10, %cst_9 [0] : vector<16x256xf32> to vector<256xf32>
    %13 = vector.shape_cast %12 : vector<256xf32> to vector<1x256xf32>
    %14 = arith.addf %11, %13 : vector<1x256xf32>
    %c0_10 = arith.constant 0 : index
    %c0_11 = arith.constant 0 : index
    %15 = vector.load %arg6[%c0_10, %c0_11] : memref<1x256xf32, #tpu.memory_space<vmem>>, vector<1x256xf32>
    tpu.vector_store %arg6[%c0_10, %c0_11], %14 {strides = array<i32>} : memref<1x256xf32, #tpu.memory_space<vmem>>, vector<1x256xf32>,
    %c0_i32_12 = arith.constant 0 : i32
    %16 = arith.cmpi eq, %arg1, %c0_i32_12 : i32
    %17 = arith.extui %16 : i1 to i32
    %c0_i32_13 = arith.constant 0 : i32
    %18 = arith.cmpi ne, %17, %c0_i32_13 : i32
    scf.if %18 {
      %c0_14 = arith.constant 0 : index
      %c0_15 = arith.constant 0 : index
      %19 = vector.load %arg6[%c0_14, %c0_15] : memref<1x256xf32, #tpu.memory_space<vmem>>, vector<1x256xf32>
      %20 = vector.shape_cast %19 : vector<1x256xf32> to vector<1x256xf32>
      %21 = vector.broadcast %20 : vector<1x256xf32> to vector<8x256xf32>
      %c0_16 = arith.constant 0 : index
      %c0_17 = arith.constant 0 : index
      %22 = vector.load %arg5[%c0_16, %c0_17] : memref<8x256xf32, #tpu.memory_space<vmem>>, vector<8x256xf32>
      tpu.vector_store %arg5[%c0_16, %c0_17], %21 {strides = array<i32>} : memref<8x256xf32, #tpu.memory_space<vmem>>, vector<8x256xf32>,
    } else {
    }
    return
  }
  func.func @transform_0(%arg0: i32, %arg1: i32) -> (i32, i32) {
    %c1_i32 = arith.constant 1 : i32
    %0 = arith.muli %arg0, %c1_i32 : i32
    %1 = arith.addi %0, %arg1 : i32
    %c0_i32 = arith.constant 0 : i32
    %c0_i32_0 = arith.constant 0 : i32
    return %1, %c0_i32 : i32, i32
  }
  func.func @transform_1(%arg0: i32, %arg1: i32) -> (i32, i32) {
    %c0_i32 = arith.constant 0 : i32
    %c0_i32_0 = arith.constant 0 : i32
    %c0_i32_1 = arith.constant 0 : i32
    return %c0_i32, %c0_i32_0 : i32, i32
  }
  func.func @transform_2(%arg0: i32, %arg1: i32) -> (i32, i32) {
    %c0_i32 = arith.constant 0 : i32
    %c0_i32_0 = arith.constant 0 : i32
    %c0_i32_1 = arith.constant 0 : i32
    return %c0_i32, %c0_i32_0 : i32, i32
  }
  func.func @transform_3(%arg0: i32, %arg1: i32) -> (i32, i32) {
    %c0_i32 = arith.constant 0 : i32
    %c0_i32_0 = arith.constant 0 : i32
    return %arg0, %c0_i32 : i32, i32
  }
}

</mosaic_0001>

<bundles_post_ra>
// kernel: tpu_custom_call.1
= control target key start
LH: loop header
LB: loop body
LE: loop exit
PB: predicated region body
PF: predicated region fallthrough
CT: control target
= control target key end

     0   :  { %8 = vsyncpa [#allocation4], 0  ;;  %s1240_s0 = inlined_call_operand.hbm [shape: bf16[32,192], index: 0, kind: input, shape index: {}]   ;;  %s1241_s1 = inlined_call_operand.hbm [shape: bf16[192,256], index: 1, kind: input, shape index: {}]   ;;  %s1242_s2 = inlined_call_operand.hbm [shape: f32[1,256], index: 2, kind: input, shape index: {}]   ;;  %s1243_s3 = inlined_call_operand.hbm [shape: f32[16,256], index: 3, kind: output, shape index: {}]  }
   0x1   :  { %10 = vsyncpa [#allocation4 + $0x1], 0 }
   0x2   :  { %11 = vsyncpa [#allocation7], 0 }
   0x3   :  { %12 = vsyncpa [#allocation5], 0 }
   0x4   :  { %14 = vsyncpa [#allocation5 + $0x1], 0  ;;  %s1072_s12 = smov 0   ;;  %s1074_s13 = smov 0  }
   0x5   :  { %s1076_s14 = smov 0   ;;  %s1078_s15 = smov 0  }
   0x6   :  { %s1080_s16 = smov 0   ;;  %s1082_s17 = smov 0  }
   0x7 LB: > { %s628_s18 = sadd.s32 4294967295, %s1045_s17   ;;  %s629_s19 = sadd.s32 4294967294, %s1045_s17   ;;  %s1045_s17 = sphi %s1082_s17, %s20_s17   ;;  %s1041_s16 = sphi %s1080_s16, %s1255_s16   ;;  %s1037_s15 = sphi %s1078_s15, %s1254_s15   ;;  %s1033_s14 = sphi %s1076_s14, %s1253_s14   ;;  %s1029_s13 = sphi %s1074_s13, %s1252_s13   ;;  %s1025_s12 = sphi %s1072_s12, %s1251_s12  }
   0x8   : > { %p54_p0 = scmp.ne.s32.totalorder %s1029_s13, %s1025_s12  ;;  %p1106_p1 = scmp.eq.s32.totalorder %s628_s18, 0 }
   0x9   : > { %p126_p2 = scmp.eq.s32.totalorder %s629_s19, 1  ;;  %p630_p4 = scmp.ge.s32.totalorder %s1045_s17, 1 }
   0xa   : > { %p1112_p3 = por %p1106_p1, %p54_p0  ;;  %p133_p6 = scmp.lt.s32.totalorder %s1045_s17, 3 }
   0xb   : > { %p1117_p5 = por %p126_p2, %p54_p0  ;;  %s144_s25 = sshll.u32 %s1241_s1, 4  ;;  %s145_s25 = int_to_ptr.hbm [resolvable:$true] %s144_s25 }
   0xc   : > { %p1125_p7 = pnand %p630_p4, %p133_p6  ;;  %s1047_s27 = smov [#allocation6]  }
   0xd   : > { %s146_s28 = sshll.u32 %s1047_s27, 4  ;;  %p633_p10 = scmp.ge.s32.totalorder %s1045_s17, 2  ;;  %s147_s28 = int_to_ptr.vmem [resolvable:$true] %s146_s28 }
   0xe   : > { %p795_p8 = pneg %p1125_p7  ;;  %s159_s4 = sshll.u32 %s1242_s2, 4  ;;  %s160_s4 = int_to_ptr.hbm [resolvable:$true] %s159_s4 }
   0xf   : > { %s1048_s5 = smov 128   ;;  %s1049_s6 = smov 8  }
  0x10   : > { %p796_p9 = pnand %p795_p8, %p1106_p1  ;;  %s1050_s7 = smov [#allocation8]  }
  0x11   : > { %s161_s8 = sshll.u32 %s1050_s7, 4  ;;  %p120_p11 = scmp.eq.s32.totalorder %s628_s18, 1  ;;  %s162_s8 = int_to_ptr.vmem [resolvable:$true] %s161_s8 }
  0x12   : > { %798 = dma.hbm_to_vmem [thread:$0]  (!%p796_p9), %s145_s25, 3072, %s147_s28, [#allocation7], %s1048_s5, %s1048_s5, %s1049_s6  }
  0x13   : > { %801 = dma.hbm_to_vmem [thread:$0]  (!%p796_p9), %s160_s4, 32, %s162_s8, [#allocation7]  }
  0x14   : > { %s32_s9 = sadd.s32 1, %s1041_s16  ;;  %s41_s10 = sadd.s32 1, %s1033_s14 }
  0x15   : > { %p34_p12 = scmp.ge.s32.totalorder %s32_s9, 2  ;;  %p48_p13 = scmp.ne.s32.totalorder %s1033_s14, %s1029_s13 }
  0x16   : > { %p49_p0 = scmp.eq.s32.totalorder %s1045_s17, 0  ;;  %p812_p4 = scmp.lt.s32.totalorder %s1045_s17, 2 }
  0x17   : > { %s1257_s9 = smov (%p34_p12, %s32_s9), 0  ;;  %p1147_p2 = por %p120_p11, %p48_p13 }
  0x18   : > { %s38_s19 = ssub.s32 %s1041_s16, %s1257_s9  ;;  %s172_s23 = sand.u32 1, %s1033_s14  }
  0x19   : > { %p39_p6 = scmp.eq.s32.totalorder %s38_s19, 0  ;;  %p50_p8 = por %p49_p0, %p48_p13 }
  0x1a   : > { %s634_s24 = sshll.u32 %s172_s23, 4  ;;  %s755_s18 = sshll.u32 %s1041_s16, 4 }
  0x1b   : > { %s1157_s25 = scalar_select %p39_p6, %s1033_s14, %s41_s10  }
  0x1c   : > { %s183_s29 = scalar_lea.hbm %s1240_s0, %s755_s18  ;;  %s176_s4 = scalar_lea.vmem [#allocation3], %s634_s24 }
  0x1d   : > { %s184_s30 = sshll.u32 %s183_s29, 4  ;;  %s186_s7 = sshll.u32 %s176_s4, 4  ;;  %s185_s30 = int_to_ptr.hbm [resolvable:$true] %s184_s30  ;;  %s187_s7 = int_to_ptr.vmem [resolvable:$true] %s186_s7 }
  0x1e   : > { %p803_p9 = pnand %p812_p4, %p50_p8  ;;  %s173_s8 = scalar_lea.sflag [#allocation4], %s172_s23 }
  0x1f   : > { %198 = sbr.rel (%p1125_p7) target bundleno = 253 (0xfd), region = 32  ;;  %s1170_s10 = sand.u32 (!%p1125_p7), 1, %s1029_s13  }
  0x20   : > { %805 = dma.hbm_to_vmem [thread:$0]  (!%p803_p9), %s185_s30, 256, %s187_s7, %s173_s8, %s1048_s5, %s1048_s5, %s1049_s6  }
  0x21   : > { %s639_s19 = sshll.u32 (!%p1125_p7), %s1170_s10, 4  ;;  %s201_s24 = scalar_lea.sflag (!%p1125_p7), [#allocation4], %s1170_s10 }
  0x22   : > { %s1176_s18 = scalar_lea.vmem (!%p1125_p7), [#allocation3], %s639_s19 }
  0x24   : > { %1012 = dma.done.wait (%p1112_p3), %s201_s24, 256  }
  0x25   : > { %1014 = vsyncadd (%p1112_p3), %s201_s24, 4294967040 }
  0x26   : > { %1016 = dma.done.wait (%p1106_p1), [#allocation7], 3104  }
  0x27   : > { %1018 = vsyncadd (%p1106_p1), [#allocation7], 4294964192  ;;  %v709_v0 = vld [vmem:[#allocation6 + $0x70] sm:$0xf]  ;;  %v773_v1 = vld [vmem:[#allocation6 + $0x74] sm:$0xf0] }
  0x28   : > { %v772_v2 = vld [vmem:[#allocation6 + $0x74] sm:$0xf]  ;;  %v710_v3 = vor.u32 %v773_v1, %v709_v0  ;;  %v711_v4 = vld [vmem:[#allocation6 + $0x78] sm:$0xf0]  ;;  %v701_v5 = vld [vmem:[#allocation6 + $0x60] sm:$0xf] }
  0x29   : > { %v771_v6 = vld [vmem:[#allocation6 + $0x64] sm:$0xf0]  ;;  %v714_v7 = vor.u32 %v772_v2, %v711_v4  ;;  %v770_v8 = vld [vmem:[#allocation6 + $0x64] sm:$0xf]  ;;  %v703_v9 = vld [vmem:[#allocation6 + $0x68] sm:$0xf0] }
  0x2a   : > { %415 = vmatpush.bf16.msra.mxu0 %v710_v3  ;;  %v702_v10 = vor.u32 %v771_v6, %v701_v5  ;;  %v693_v11 = vld [vmem:[#allocation6 + $0x50] sm:$0xf]  ;;  %v706_v12 = vor.u32 %v770_v8, %v703_v9  ;;  %v769_v13 = vld [vmem:[#allocation6 + $0x54] sm:$0xf0]  ;;  %v780_v14 = vld [vmem:[#allocation6 + $0xb4] sm:$0xf] }
  0x2b   : > { %443 = vmatpush.bf16.msra.mxu2 %v714_v7  ;;  %v743_v15 = vld [vmem:[#allocation6 + $0xb8] sm:$0xf0]  ;;  %v768_v16 = vld [vmem:[#allocation6 + $0x54] sm:$0xf]  ;;  %v778_v19 = vld [vmem:[#allocation6 + $0xa4] sm:$0xf]  ;;  %v694_v21 = vor.u32 %v769_v13, %v693_v11 }
  0x2c   : > { %v695_v17 = vld [vmem:[#allocation6 + $0x58] sm:$0xf0]  ;;  %v746_v18 = vor.u32 %v780_v14, %v743_v15  ;;  %v735_v20 = vld [vmem:[#allocation6 + $0xa8] sm:$0xf0]  ;;  %v685_v22 = vld [vmem:[#allocation6 + $0x40] sm:$0xf]  ;;  %v245_v14 = vlaneseq }
  0x2d   : > { %v767_v23 = vld [vmem:[#allocation6 + $0x44] sm:$0xf0]  ;;  %v738_v24 = vor.u32 %v778_v19, %v735_v20  ;;  %v698_v25 = vor.u32 %v768_v16, %v695_v17  ;;  %v741_v26 = vld [vmem:[#allocation6 + $0xb0] sm:$0xf]  ;;  %v781_v27 = vld [vmem:[#allocation6 + $0xb4] sm:$0xf0] }
  0x2e   : > { %416 = vmatpush.bf16.msra.mxu0 %v702_v10  ;;  %461 = vmatpush.bf16.msra.mxu3 %v746_v18  ;;  %v776_v28 = vld [vmem:[#allocation6 + $0x94] sm:$0xf]  ;;  %v766_v29 = vld [vmem:[#allocation6 + $0x44] sm:$0xf]  ;;  %v687_v30 = vld [vmem:[#allocation6 + $0x48] sm:$0xf0]  ;;  %v742_v31 = vor.u32 %v781_v27, %v741_v26  ;;  %v686_v34 = vor.u32 %v767_v23, %v685_v22 }
  0x2f   : > { %444 = vmatpush.bf16.msra.mxu2 %v706_v12  ;;  %v727_v32 = vld [vmem:[#allocation6 + $0x98] sm:$0xf0]  ;;  %v733_v33 = vld [vmem:[#allocation6 + $0xa0] sm:$0xf]  ;;  %v677_v35 = vld [vmem:[#allocation6 + $0x30] sm:$0xf]  ;;  %v690_v38 = vor.u32 %v766_v29, %v687_v30 }
  0x30   : > { %v730_v36 = vor.u32 %v776_v28, %v727_v32  ;;  %v779_v37 = vld [vmem:[#allocation6 + $0xa4] sm:$0xf0]  ;;  %v765_v39 = vld [vmem:[#allocation6 + $0x34] sm:$0xf0]  ;;  %433 = vmatpush.bf16.msra.mxu1 %v742_v31  ;;  %v774_v41 = vld [vmem:[#allocation6 + $0x84] sm:$0xf] }
  0x31   : > { %v734_v40 = vor.u32 %v779_v37, %v733_v33  ;;  %v719_v42 = vld [vmem:[#allocation6 + $0x88] sm:$0xf0]  ;;  %v764_v43 = vld [vmem:[#allocation6 + $0x34] sm:$0xf]  ;;  %v679_v44 = vld [vmem:[#allocation6 + $0x38] sm:$0xf0]  ;;  %v678_v47 = vor.u32 %v765_v39, %v677_v35 }
  0x32   : > { %417 = vmatpush.bf16.msra.mxu0 %v694_v21  ;;  %462 = vmatpush.bf16.msra.mxu3 %v738_v24  ;;  %v725_v45 = vld [vmem:[#allocation6 + $0x90] sm:$0xf]  ;;  %v777_v46 = vld [vmem:[#allocation6 + $0x94] sm:$0xf0]  ;;  %v722_v48 = vor.u32 %v774_v41, %v719_v42  ;;  %v756_v49 = vld [vmem:[%s1176_s18 + $0x4] sm:$0xf]  ;;  %v682_v51 = vor.u32 %v764_v43, %v679_v44 }
  0x33   : > { %445 = vmatpush.bf16.msra.mxu2 %v698_v25  ;;  %v647_v50 = vld [vmem:[%s1176_s18 + $0x8] sm:$0xf0]  ;;  %v669_v52 = vld [vmem:[#allocation6 + $0x20] sm:$0xf]  ;;  %v763_v53 = vld [vmem:[#allocation6 + $0x24] sm:$0xf0]  ;;  %v726_v55 = vor.u32 %v777_v46, %v725_v45 }
  0x34   : > { %v762_v54 = vld [vmem:[#allocation6 + $0x24] sm:$0xf]  ;;  %434 = vmatpush.bf16.msra.mxu1 %v734_v40  ;;  %v671_v56 = vld [vmem:[#allocation6 + $0x28] sm:$0xf0]  ;;  %v717_v57 = vld [vmem:[#allocation6 + $0x80] sm:$0xf]  ;;  %v650_v59 = vor.u32 %v756_v49, %v647_v50  ;;  %v670_v60 = vor.u32 %v763_v53, %v669_v52 }
  0x35   : > { %v775_v58 = vld [vmem:[#allocation6 + $0x84] sm:$0xf0]  ;;  %vm411_vm0 = vcmask 523264   ;;  %v674_v61 = vor.u32 %v762_v54, %v671_v56  ;;  %v661_v62 = vld [vmem:[#allocation6 + $0x10] sm:$0xf]  ;;  %vm1192_vm1 = vcmp.lt.s32.totalorder %v245_v14, 256 }
  0x36   : > { %418 = vmatpush.bf16.msra.mxu0 %v686_v34  ;;  %463 = vmatpush.bf16.msra.mxu3 %v730_v36  ;;  %v761_v63 = vld [vmem:[#allocation6 + $0x14] sm:$0xf0]  ;;  %v718_v0 = vor.u32 %v775_v58, %v717_v57  ;;  %v760_v1 = vld [vmem:[#allocation6 + $0x14] sm:$0xf]  ;;  %v663_v2 = vld [vmem:[#allocation6 + $0x18] sm:$0xf0] }
  0x37   : > { %446 = vmatpush.bf16.msra.mxu2 %v690_v38  ;;  %v662_v3 = vor.u32 %v761_v63, %v661_v62  ;;  %v666_v4 = vor.u32 %v760_v1, %v663_v2  ;;  %v653_v5 = vld [vmem:[#allocation6] sm:$0xf]  ;;  %v759_v6 = vld [vmem:[#allocation6 + $0x4] sm:$0xf0]  ;;  %v758_v7 = vld [vmem:[#allocation6 + $0x4] sm:$0xf] }
  0x38   : > { %435 = vmatpush.bf16.msra.mxu1 %v726_v55  ;;  %v655_v8 = vld [vmem:[#allocation6 + $0x8] sm:$0xf0]  ;;  %v654_v9 = vor.u32 %v759_v6, %v653_v5  ;;  %v645_v10 = vld [vmem:[%s1176_s18] sm:$0xf]  ;;  %v757_v11 = vld [vmem:[%s1176_s18 + $0x4] sm:$0xf0] }
  0x39   : > { %v658_v12 = vor.u32 %v758_v7, %v655_v8  ;;  %v646_v13 = vor.u32 %v757_v11, %v645_v10  ;;  %v276_v16 = vld [vmem:[#allocation8] sm:$0x3]  ;;  %v1051_v18 = vmov 0.0   ;;  %vm493_vm2 = vcmask 1040384   ;;  %s782_s20 = sshll.u32 %s1037_s15, 4  ;;  %s237_s6 = scalar_lea.vmem [#allocation9], %s639_s19 }
  0x3a   : > { %419 = vmatpush.bf16.msra.mxu0 %v678_v47  ;;  %464 = vmatpush.bf16.msra.mxu3 %v722_v48  ;;  %249 = vst.msk [vmem:[#allocation2] sm:$0x3] %vm1192_vm1, %v1051_v18  ;;  %v278_v19 = vperm.slane %v276_v16, 0  ;;  %v279_v25 = vperm.slane %v276_v16, 1  ;;  %s525_s5 = scalar_lea.hbm %s1243_s3, %s782_s20  ;;  %s527_s23 = sshll.u32 %s237_s6, 4  ;;  %s528_s23 = int_to_ptr.vmem [resolvable:$true] %s527_s23 }
  0x3b   : > { %447 = vmatpush.bf16.msra.mxu2 %v682_v51  ;;  %s529_s27 = sshll.u32 %s525_s5, 4  ;;  %s514_s28 = scalar_lea.sflag [#allocation5], %s1170_s10  ;;  %s530_s27 = int_to_ptr.hbm [resolvable:$true] %s529_s27 }
  0x3c   : > { %436 = vmatpush.bf16.msra.mxu1 %v718_v0  ;;  %s973_s29 = sshra.s32 %s530_s27, 4  ;;  %s979_s7 = scalar_lea.hbm %s1243_s3, 32  ;;  %s974_s29 = int_to_ptr.hbm [resolvable:$true] %s973_s29 }
  0x3d   : > { %748 = vmatmul.msk.bf16.vlgmr.msra.gmra.mxu3 %vm411_vm0, %v650_v59  ;;  %s975_s15 = scalar_lea.hbm %s974_s29, 16  ;;  %p980_p11 = scmp.lt.s32.totalorder %s974_s29, %s1243_s3 }
  0x3e   : > { %420 = vmatpush.bf16.msra.mxu0 %v670_v60  ;;  %p976_p1 = scmp.ne.s32.totalorder %s974_s29, %s975_s15  ;;  %p981_p12 = scmp.lt.s32.totalorder %s979_s7, %s975_s15 }
  0x3f   : > { %448 = vmatpush.bf16.msra.mxu2 %v674_v61  ;;  %747 = vmatmul.msk.bf16.vlgmr.msra.gmra.mxu1 %vm411_vm0, %v650_v59 }
  0x40   : > { %p977_p3 = pnand %p976_p1, %p1147_p2  ;;  %p982_p13 = por %p981_p12, %p980_p11 }
  0x41   : > { %v475_v54 = vld [vmem:[#allocation2] sm:$0x3] }
  0x42   : > { %421 = vmatpush.bf16.msra.mxu0 %v662_v3  ;;  %p978_p7 = pneg %p977_p3 }
  0x43   : > { %449 = vmatpush.bf16.msra.mxu2 %v666_v4 }
  0x44   : > { %p983_p0 = pnand %p982_p13, %p978_p7 }
  0x46   : > { %422 = vmatpush.bf16.msra.mxu0 %v654_v9 }
  0x47   : > { %450 = vmatpush.bf16.msra.mxu2 %v658_v12 }
  0x49   : > { %423 = vmatmul.bf16.vlgmr.msra.gmra.mxu0 %v646_v13 }
  0x4a   : > { %451 = vmatmul.bf16.vlgmr.msra.gmra.mxu2 %v646_v13 }
  0xbc   : > { %v438_v17 = vpop.f32.mrf.mxu1 }
  0xc0   : > { %v466_v22 = vpop.f32.mrf.mxu3 }
  0xc4   : > { %v440_v27 = vpop.f32.mrf.mxu1 }
  0xc6   : > { %v424_v20 = vpop.f32.mrf.mxu0 }
  0xc7   : > { %v425_v21 = vadd.f32 %v424_v20, %v278_v19 }
  0xc8   : > { %v468_v37 = vpop.f32.mrf.mxu3 }
  0xc9   : > { %v439_v23 = vadd.f32 %v438_v17, %v425_v21 }
  0xcb   : > { %v471_v29 = vmax.f32 %v439_v23, 0.0 }
  0xcd   : > { %v452_v24 = vpop.f32.mrf.mxu2 }
  0xce   : > { %v426_v26 = vpop.f32.mrf.mxu0  ;;  %v453_v31 = vadd.f32 %v452_v24, %v279_v25 }
  0xcf   : > { %v427_v28 = vadd.f32 %v426_v26, %v278_v19 }
  0xd0   : > { %v467_v35 = vadd.f32 %v466_v22, %v453_v31 }
  0xd1   : > { %v441_v30 = vadd.f32 %v440_v27, %v427_v28 }
  0xd2   : > { %v472_v40 = vmax.f32 %v467_v35, 0.0 }
  0xd3   : > { %v473_v32 = vmax.f32 %v441_v30, 0.0 }
  0xd5   : > { %v476_v33 = vadd.f32 %v473_v32, %v471_v29  ;;  %v454_v34 = vpop.f32.mrf.mxu2 }
  0xd6   : > { %v455_v36 = vadd.f32 %v454_v34, %v279_v25 }
  0xd7   : > { %v477_v38 = vrot.slane %v476_v33, 4 }
  0xd8   : > { %v469_v39 = vadd.f32 %v468_v37, %v455_v36 }
  0xd9   : > { %v478_v41 = vadd.f32 %v477_v38, %v476_v33 }
  0xda   : > { %v474_v42 = vmax.f32 %v469_v39, 0.0 }
  0xdb   : > { %v479_v44 = vrot.slane %v478_v41, 2 }
  0xdc   : > { %v483_v43 = vadd.f32 %v474_v42, %v472_v40 }
  0xdd   : > { %v480_v47 = vadd.f32 %v479_v44, %v478_v41 }
  0xde   : > { %v484_v45 = vrot.slane %v483_v43, 4 }
  0xdf   : > { %v481_v50 = vrot.slane %v480_v47, 1 }
  0xe0   : > { %v485_v46 = vadd.f32 %v484_v45, %v483_v43 }
  0xe1   : > { %v482_v53 = vadd.f32 %v481_v50, %v480_v47 }
  0xe2   : > { %v486_v48 = vrot.slane %v485_v46, 2 }
  0xe4   : > { %v487_v49 = vadd.f32 %v486_v48, %v485_v46 }
  0xe6   : > { %v488_v51 = vrot.slane %v487_v49, 1 }
  0xe8   : > { %v489_v52 = vadd.f32 %v488_v51, %v487_v49 }
  0xea   : > { %v492_v55 = vrot.slane %v489_v52, 7 }
  0xec   : > { %v494_v56 = vsel %vm493_vm2, %v482_v53, %v492_v55 }
  0xed   : > { %v496_v57 = vadd.f32 %v494_v56, %v475_v54 }
  0xef   : > { %501 = vst.msk [vmem:[#allocation2] sm:$0x3] %vm1192_vm1, %v496_v57 }
  0xf6   : > { %v505_v58 = vld [vmem:[#allocation2] sm:$0x3] }
  0xf7   : > { %v507_v59 = vperm.slane %v505_v58, 0  ;;  %v508_v60 = vperm.slane %v505_v58, 1 }
  0xf9   : > { %511 = vst [vmem:[%s237_s6] sm:$0xff] %v507_v59 }
  0xfa   : > { %512 = vst [vmem:[%s237_s6 + $0x8] sm:$0xff] %v508_v60 }
  0xfb   : > { %986 = shalt.err (!%p983_p0)
}
  0xfc   : > { %793 = dma.vmem_to_hbm [thread:$0]  (%p1147_p2), %s528_s23, 256, %s530_s27, %s514_s28  }
  0xfd PF: > { %s541_s10 = sand.u32 1, %s1025_s12   ;;  %p807_p4 = pnand %p633_p10, %p1117_p5 }
  0xfe   : > { %s542_s24 = scalar_lea.sflag [#allocation5], %s541_s10 }
  0xff   : > { %p808_p6 = pneg %p807_p4 }
 0x101   : > { %1020 = dma.done.wait (%p808_p6), %s542_s24, 256  }
 0x102   : > { %1022 = vsyncadd (%p808_p6), %s542_s24, 4294967040  ;;  %s20_s17 = sadd.s32 1, %s1045_s17   ;;  %s1251_s12 = smov %s1029_s13 }
 0x103   : > { %p17_p8 = scmp.ge.s32.totalorder %s20_s17, 4   ;;  %s1252_s13 = smov %s1033_s14 }
 0x104   : > { %s1253_s14 = smov %s1157_s25  ;;  %s1254_s15 = smov %s1041_s16 }
 0x105   : > { %s1255_s16 = smov %s1257_s9  ;;  %19 = sbr.rel (!%p17_p8) target bundleno = 7 (0x7), region = 93 }
 0x10a   :  { %548 = vsyncpa [#allocation4], 1 }
 0x10b   :  { %550 = vsyncpa [#allocation4 + $0x1], 1 }
 0x10c   :  { %551 = vsyncpa [#allocation7], 1 }
 0x10d   :  { %552 = vsyncpa [#allocation5], 1 }
 0x10e   :  { %554 = vsyncpa [#allocation5 + $0x1], 1 }

</bundles_post_ra>
